<compile_context>
chip_gen: v6e
topology: v6e:2x2x1
jax: 0.10.0
libtpu: 0.0.40
codegen_flags: <defaults>
</compile_context>

<pallas_src>
import functools

import jax
import jax.numpy as jnp
from jax import lax
from jax.experimental import pallas as pl
from jax.experimental.pallas import tpu as pltpu


def _cobweb_kernel(a_ref, m_ref, lv_ref,
                   mean_root_ref, logvar_root_ref, dkl_ref,
                   *, eps, n_valid):
    """One row tile: (T,1)/(T,2H)/(T,2H) -> (T,H)/(T,H)/(T,2)."""
    H = mean_root_ref.shape[-1]          # lane-padded hidden size (mult. of 128)

    a0 = a_ref[...]                      # sigmoid(w), precomputed in the wrapper
    a1 = 1.0 - a0

    # Row k = [child0_k | child1_k]; H is a multiple of 128 so both halves are
    # lane-tile-aligned static slices.
    m0, m1 = m_ref[:, :H], m_ref[:, H:]
    lv0, lv1 = lv_ref[:, :H], lv_ref[:, H:]

    # mean_root = a0*m0 + a1*m1 ; child offsets from the root:
    #   m0 - mean_root =  a1*(m0 - m1),   m1 - mean_root = -a0*(m0 - m1)
    diff = m0 - m1
    mean_root = a0 * m0 + a1 * m1
    d0 = (a1 * diff) ** 2
    d1 = (a0 * diff) ** 2

    v0 = jnp.exp(lv0)
    v1 = jnp.exp(lv1)
    t0 = v0 + d0
    t1 = v1 + d1
    var_root = a0 * t0 + a1 * t1 + eps   # matches reference's log(var_root + eps)
    logvar_root = jnp.log(var_root)

    mean_root_ref[...] = mean_root
    logvar_root_ref[...] = logvar_root

    # EUP approximate reciprocal + one Newton step: avoids the multi-op VPU
    # divide while keeping dkl well within the reference tolerance.
    r = pl.reciprocal(var_root, approx=True)
    inv_var = r * (2.0 - var_root * r)

    if n_valid != H:
        # Lane-padded fallback (n_hidden % 128 != 0): drop padded columns from
        # the dkl reductions.  (Padded logvar columns are 0 and padded
        # logvar_root is log(1+eps) ~ 1e-8, so only this term needs masking.)
        lane = lax.broadcasted_iota(jnp.int32, (1, H), 1)
        inv_var = jnp.where(lane < n_valid, inv_var, 0.0)

    # KL(child_i || root) reduced over the hidden dim, as split XLU reductions:
    #   dkl_i = 0.5 * (sum(lvr) - sum(lv_i) - H + sum(t_i / var_root))
    s_lvr = jnp.sum(logvar_root, axis=1, keepdims=True)
    s_lv0 = jnp.sum(lv0, axis=1, keepdims=True)
    s_lv1 = jnp.sum(lv1, axis=1, keepdims=True)
    s_t0 = jnp.sum(t0 * inv_var, axis=1, keepdims=True)
    s_t1 = jnp.sum(t1 * inv_var, axis=1, keepdims=True)

    nv = float(n_valid)
    dkl_ref[:, 0:1] = 0.5 * (s_lvr - s_lv0 - nv + s_t0)
    dkl_ref[:, 1:2] = 0.5 * (s_lvr - s_lv1 - nv + s_t1)


def _vmem_tile_budget_bytes():
    """Generation-aware VMEM budget for the double-buffered row tile."""
    kind = ""
    try:
        kind = jax.devices()[0].device_kind.lower()
    except Exception:
        pass
    if "v5 lite" in kind or "v5e" in kind:
        return 13 << 20      # v5e: 16 MiB default scoped / 128 MiB physical
    if "v7" in kind or "7x" in kind:
        return 22 << 20      # v7x: only 64 MiB physical VMEM per TensorCore
    return 26 << 20          # v6e and default: 128 MiB physical VMEM


def _per_row_vmem_bytes(h_pad):
    # f32 per cluster row per pipeline buffer:
    #   inputs  : 1 + 2H + 2H   (alpha, mean pairs, logvar pairs)
    #   outputs : H + H + 2     (mean_root, logvar_root, dkl pair)
    # x2 for double buffering.
    return (6 * h_pad + 3) * 4 * 2


def _pick_row_tile(n_clusters, h_pad, budget_bytes):
    """Rows per grid step: as big as the VMEM budget allows (sublane-aligned),
    but clamped so the grid has >= 2 steps (v7x megacore + pipeline overlap)."""
    if n_clusters <= 8:
        return n_clusters                       # tiny problem: single full block
    t = max(8, (budget_bytes // _per_row_vmem_bytes(h_pad)) // 8 * 8)
    half = (((n_clusters + 1) // 2) + 7) // 8 * 8
    return min(t, half)


def cobweb_tree_layer(cluster_weight, mean_leaf, logvar_leaf, eps=1e-8):
    """Pallas implementation of CobwebNNTreeLayer.forward."""
    n_clusters, one = cluster_weight.shape
    assert one == 1
    n_hidden = mean_leaf.shape[-1]
    assert mean_leaf.shape == (n_clusters * 2, n_hidden)
    assert logvar_leaf.shape == (n_clusters * 2, n_hidden)

    cluster_weight = cluster_weight.astype(jnp.float32)
    mean_leaf = mean_leaf.astype(jnp.float32)
    logvar_leaf = logvar_leaf.astype(jnp.float32)

    C, H = n_clusters, n_hidden
    # Lane alignment: the kernel splits each row at lane offset H, so H must be
    # a multiple of 128; otherwise pad (padded columns are masked out of the
    # dkl sums in-kernel and sliced off the per-column outputs here).
    h_pad = ((H + 127) // 128) * 128
    if h_pad != H:
        pad = h_pad - H
        mean_leaf = jnp.pad(mean_leaf, ((0, 0), (0, pad)))
        logvar_leaf = jnp.pad(logvar_leaf, ((0, 0), (0, pad)))

    # Free contiguous views: row k = [child0_k | child1_k].
    m_pairs = mean_leaf.reshape(C, 2 * h_pad)
    lv_pairs = logvar_leaf.reshape(C, 2 * h_pad)

    # sigmoid of the tiny (C,1) weight: computed once here (also the alpha_flat
    # output) and streamed into the kernel instead of re-applying per tile.
    alpha0 = jax.nn.sigmoid(cluster_weight)              # (C, 1)

    budget = _vmem_tile_budget_bytes()
    T = _pick_row_tile(C, h_pad, budget)
    grid = (pl.cdiv(C, T),)
    footprint = _per_row_vmem_bytes(h_pad) * T
    vmem_limit = max(32 << 20, footprint + (6 << 20))    # + Mosaic scratch margin

    def row_spec(cols):
        return pl.BlockSpec((T, cols), lambda i: (i, 0))

    kernel = functools.partial(_cobweb_kernel, eps=eps, n_valid=H)

    # NOTE: when C % T != 0 the padded rows of the last block hold stale VMEM
    # data; their exp/log results are discarded by the partial writeback, so
    # outputs stay correct (only NaN-checking debug modes would notice).
    mean_root, logvar_root, dkl_pair = pl.pallas_call(
        kernel,
        grid=grid,
        in_specs=[
            row_spec(1),             # sigmoid(cluster_weight)
            row_spec(2 * h_pad),     # mean child pairs
            row_spec(2 * h_pad),     # logvar child pairs
        ],
        out_specs=[
            row_spec(h_pad),         # mean_root
            row_spec(h_pad),         # logvar_root
            row_spec(2),             # dkl pair (child0, child1)
        ],
        out_shape=(
            jax.ShapeDtypeStruct((C, h_pad), jnp.float32),
            jax.ShapeDtypeStruct((C, h_pad), jnp.float32),
            jax.ShapeDtypeStruct((C, 2), jnp.float32),
        ),
        compiler_params=pltpu.CompilerParams(
            dimension_semantics=("parallel",),
            vmem_limit_bytes=vmem_limit),
    )(alpha0, m_pairs, lv_pairs)

    if h_pad != H:
        mean_root = mean_root[:, :H]
        logvar_root = logvar_root[:, :H]

    alpha_flat = jnp.concatenate([alpha0, 1.0 - alpha0], axis=1).reshape(-1)
    dkl = dkl_pair.reshape(-1)        # torch flat layout: c0/ch0, c0/ch1, c1/ch0, ...
    return mean_root, logvar_root, alpha_flat, dkl


def _reference(cluster_weight, mean_leaf, logvar_leaf, eps=1e-8):
    """Pure-JAX transcription of the PyTorch forward for verification."""
    n_hidden = mean_leaf.shape[-1]
    alpha = jax.nn.sigmoid(cluster_weight)
    alpha = jnp.concatenate([alpha, 1 - alpha], axis=1)[..., None]   # (C,2,1)
    m = mean_leaf.reshape(-1, 2, n_hidden)
    lv = logvar_leaf.reshape(-1, 2, n_hidden)
    mean_root = (alpha * m).sum(axis=1)
    var_leaf = jnp.exp(lv)
    diff_sq = (m - mean_root[:, None, :]) ** 2
    var_root = (alpha * (var_leaf + diff_sq)).sum(axis=1)
    logvar_root = jnp.log(var_root + eps)
    mr_dkl = jnp.repeat(mean_root, 2, axis=0)
    lvr_dkl = jnp.repeat(logvar_root, 2, axis=0)
    dkl = 0.5 * jnp.sum(
        lvr_dkl - logvar_leaf - 1 + jnp.exp(logvar_leaf - lvr_dkl)
        + (mean_leaf - mr_dkl) ** 2 / jnp.exp(lvr_dkl), axis=1)
    return mean_root, logvar_root, alpha.reshape(-1), dkl


if __name__ == "__main__":
    def run_case(n_clusters, n_hidden):
        key = jax.random.PRNGKey(0)
        kw, km, kv = jax.random.split(key, 3)
        w = 0.5 * jax.random.normal(kw, (n_clusters, 1), dtype=jnp.float32)
        m = jax.random.normal(km, (n_clusters * 2, n_hidden), dtype=jnp.float32)
        lv = 0.1 * jax.random.normal(kv, (n_clusters * 2, n_hidden),
                                     dtype=jnp.float32)

        outs = jax.block_until_ready(cobweb_tree_layer(w, m, lv))
        refs = _reference(w, m, lv)

        # dkl uses the Newton-refined EUP reciprocal and re-associated sums, so
        # it gets a slightly looser (but still tight) tolerance.
        tols = (1e-4, 1e-4, 1e-4, 1e-3)
        for o, r, tol in zip(outs, refs, tols):
            assert o.shape == r.shape, (o.shape, r.shape)
            assert jnp.allclose(o, r, rtol=tol, atol=tol), \
                float(jnp.max(jnp.abs(o - r)))

    run_case(n_clusters=16, n_hidden=128)   # lane-aligned fast path, 2 grid steps
    run_case(n_clusters=10, n_hidden=96)    # padded hidden dim + partial last block
    print("KERNEL_OK")
</pallas_src>

<mosaic_0001>
module attributes {stable_mosaic.version = 11 : i64} {
  func.func @_cobweb_kernel(%arg0: i32, %arg1: memref<8x1xf32, #tpu.memory_space<vmem>>, %arg2: memref<8x256xf32, #tpu.memory_space<vmem>>, %arg3: memref<8x256xf32, #tpu.memory_space<vmem>>, %arg4: memref<8x128xf32, #tpu.memory_space<vmem>>, %arg5: memref<8x128xf32, #tpu.memory_space<vmem>>, %arg6: memref<8x2xf32, #tpu.memory_space<vmem>>) attributes {dimension_semantics = [#tpu.dimension_semantics<parallel>], iteration_bounds = array<i64: 2>, scalar_prefetch = 0 : i64, scratch_operands = 0 : i64, tpu.core_type = #tpu.core_type<tc>, window_params = [{transform_indices = @transform_0, window_bounds = array<i64: 8, 1>}, {transform_indices = @transform_1, window_bounds = array<i64: 8, 256>}, {transform_indices = @transform_2, window_bounds = array<i64: 8, 256>}, {transform_indices = @transform_3, window_bounds = array<i64: 8, 128>}, {transform_indices = @transform_4, window_bounds = array<i64: 8, 128>}, {transform_indices = @transform_5, window_bounds = array<i64: 8, 2>}]} {
    %c0 = arith.constant 0 : index
    %c0_0 = arith.constant 0 : index
    %0 = vector.load %arg1[%c0, %c0_0] : memref<8x1xf32, #tpu.memory_space<vmem>>, vector<8x1xf32>
    %cst = arith.constant 1.000000e+00 : f32
    %1 = vector.broadcast %cst : f32 to vector<8x1xf32>
    %2 = arith.subf %1, %0 : vector<8x1xf32>
    %c0_1 = arith.constant 0 : index
    %c0_2 = arith.constant 0 : index
    %3 = vector.load %arg2[%c0_1, %c0_2] : memref<8x256xf32, #tpu.memory_space<vmem>>, vector<8x128xf32>
    %c0_3 = arith.constant 0 : index
    %c128 = arith.constant 128 : index
    %4 = vector.load %arg2[%c0_3, %c128] : memref<8x256xf32, #tpu.memory_space<vmem>>, vector<8x128xf32>
    %c0_4 = arith.constant 0 : index
    %c0_5 = arith.constant 0 : index
    %5 = vector.load %arg3[%c0_4, %c0_5] : memref<8x256xf32, #tpu.memory_space<vmem>>, vector<8x128xf32>
    %c0_6 = arith.constant 0 : index
    %c128_7 = arith.constant 128 : index
    %6 = vector.load %arg3[%c0_6, %c128_7] : memref<8x256xf32, #tpu.memory_space<vmem>>, vector<8x128xf32>
    %7 = arith.subf %3, %4 : vector<8x128xf32>
    %8 = vector.broadcast %0 : vector<8x1xf32> to vector<8x128xf32>
    %9 = arith.mulf %8, %3 : vector<8x128xf32>
    %10 = vector.broadcast %2 : vector<8x1xf32> to vector<8x128xf32>
    %11 = arith.mulf %10, %4 : vector<8x128xf32>
    %12 = arith.addf %9, %11 : vector<8x128xf32>
    %13 = vector.broadcast %2 : vector<8x1xf32> to vector<8x128xf32>
    %14 = arith.mulf %13, %7 : vector<8x128xf32>
    %15 = arith.mulf %14, %14 : vector<8x128xf32>
    %16 = vector.broadcast %0 : vector<8x1xf32> to vector<8x128xf32>
    %17 = arith.mulf %16, %7 : vector<8x128xf32>
    %18 = arith.mulf %17, %17 : vector<8x128xf32>
    %19 = math.exp %5 : vector<8x128xf32>
    %20 = math.exp %6 : vector<8x128xf32>
    %21 = arith.addf %19, %15 : vector<8x128xf32>
    %22 = arith.addf %20, %18 : vector<8x128xf32>
    %23 = vector.broadcast %0 : vector<8x1xf32> to vector<8x128xf32>
    %24 = arith.mulf %23, %21 : vector<8x128xf32>
    %25 = vector.broadcast %2 : vector<8x1xf32> to vector<8x128xf32>
    %26 = arith.mulf %25, %22 : vector<8x128xf32>
    %27 = arith.addf %24, %26 : vector<8x128xf32>
    %cst_8 = arith.constant 9.99999993E-9 : f32
    %28 = vector.broadcast %cst_8 : f32 to vector<8x128xf32>
    %29 = arith.addf %27, %28 : vector<8x128xf32>
    %30 = math.log %29 : vector<8x128xf32>
    %c0_9 = arith.constant 0 : index
    %c0_10 = arith.constant 0 : index
    %31 = vector.load %arg4[%c0_9, %c0_10] : memref<8x128xf32, #tpu.memory_space<vmem>>, vector<8x128xf32>
    tpu.vector_store %arg4[%c0_9, %c0_10], %12 {strides = array<i32>} : memref<8x128xf32, #tpu.memory_space<vmem>>, vector<8x128xf32>,
    %c0_11 = arith.constant 0 : index
    %c0_12 = arith.constant 0 : index
    %32 = vector.load %arg5[%c0_11, %c0_12] : memref<8x128xf32, #tpu.memory_space<vmem>>, vector<8x128xf32>
    tpu.vector_store %arg5[%c0_11, %c0_12], %30 {strides = array<i32>} : memref<8x128xf32, #tpu.memory_space<vmem>>, vector<8x128xf32>,
    %33 = tpu.reciprocal %29 {approx = true} : vector<8x128xf32> -> vector<8x128xf32>
    %34 = arith.mulf %29, %33 : vector<8x128xf32>
    %cst_13 = arith.constant 2.000000e+00 : f32
    %35 = vector.broadcast %cst_13 : f32 to vector<8x128xf32>
    %36 = arith.subf %35, %34 : vector<8x128xf32>
    %37 = arith.mulf %33, %36 : vector<8x128xf32>
    %cst_14 = arith.constant dense<0.000000e+00> : vector<8xf32>
    %38 = vector.multi_reduction <add>, %30, %cst_14 [1] : vector<8x128xf32> to vector<8xf32>
    %39 = vector.shape_cast %38 : vector<8xf32> to vector<8x1xf32>
    %cst_15 = arith.constant dense<0.000000e+00> : vector<8xf32>
    %40 = vector.multi_reduction <add>, %5, %cst_15 [1] : vector<8x128xf32> to vector<8xf32>
    %41 = vector.shape_cast %40 : vector<8xf32> to vector<8x1xf32>
    %cst_16 = arith.constant dense<0.000000e+00> : vector<8xf32>
    %42 = vector.multi_reduction <add>, %6, %cst_16 [1] : vector<8x128xf32> to vector<8xf32>
    %43 = vector.shape_cast %42 : vector<8xf32> to vector<8x1xf32>
    %44 = arith.mulf %21, %37 : vector<8x128xf32>
    %cst_17 = arith.constant dense<0.000000e+00> : vector<8xf32>
    %45 = vector.multi_reduction <add>, %44, %cst_17 [1] : vector<8x128xf32> to vector<8xf32>
    %46 = vector.shape_cast %45 : vector<8xf32> to vector<8x1xf32>
    %47 = arith.mulf %22, %37 : vector<8x128xf32>
    %cst_18 = arith.constant dense<0.000000e+00> : vector<8xf32>
    %48 = vector.multi_reduction <add>, %47, %cst_18 [1] : vector<8x128xf32> to vector<8xf32>
    %49 = vector.shape_cast %48 : vector<8xf32> to vector<8x1xf32>
    %50 = arith.subf %39, %41 : vector<8x1xf32>
    %cst_19 = arith.constant 1.280000e+02 : f32
    %51 = vector.broadcast %cst_19 : f32 to vector<8x1xf32>
    %52 = arith.subf %50, %51 : vector<8x1xf32>
    %53 = arith.addf %52, %46 : vector<8x1xf32>
    %cst_20 = arith.constant 5.000000e-01 : f32
    %54 = vector.broadcast %cst_20 : f32 to vector<8x1xf32>
    %55 = arith.mulf %54, %53 : vector<8x1xf32>
    %c0_21 = arith.constant 0 : index
    %c0_22 = arith.constant 0 : index
    %56 = vector.load %arg6[%c0_21, %c0_22] : memref<8x2xf32, #tpu.memory_space<vmem>>, vector<8x1xf32>
    tpu.vector_store %arg6[%c0_21, %c0_22], %55 {strides = array<i32>} : memref<8x2xf32, #tpu.memory_space<vmem>>, vector<8x1xf32>,
    %57 = arith.subf %39, %43 : vector<8x1xf32>
    %cst_23 = arith.constant 1.280000e+02 : f32
    %58 = vector.broadcast %cst_23 : f32 to vector<8x1xf32>
    %59 = arith.subf %57, %58 : vector<8x1xf32>
    %60 = arith.addf %59, %49 : vector<8x1xf32>
    %cst_24 = arith.constant 5.000000e-01 : f32
    %61 = vector.broadcast %cst_24 : f32 to vector<8x1xf32>
    %62 = arith.mulf %61, %60 : vector<8x1xf32>
    %c0_25 = arith.constant 0 : index
    %c1 = arith.constant 1 : index
    %63 = vector.load %arg6[%c0_25, %c1] : memref<8x2xf32, #tpu.memory_space<vmem>>, vector<8x1xf32>
    tpu.vector_store %arg6[%c0_25, %c1], %62 {strides = array<i32>} : memref<8x2xf32, #tpu.memory_space<vmem>>, vector<8x1xf32>,
    return
  }
  func.func @transform_0(%arg0: i32) -> (i32, i32) {
    %c0_i32 = arith.constant 0 : i32
    %c0_i32_0 = arith.constant 0 : i32
    return %arg0, %c0_i32 : i32, i32
  }
  func.func @transform_1(%arg0: i32) -> (i32, i32) {
    %c0_i32 = arith.constant 0 : i32
    %c0_i32_0 = arith.constant 0 : i32
    return %arg0, %c0_i32 : i32, i32
  }
  func.func @transform_2(%arg0: i32) -> (i32, i32) {
    %c0_i32 = arith.constant 0 : i32
    %c0_i32_0 = arith.constant 0 : i32
    return %arg0, %c0_i32 : i32, i32
  }
  func.func @transform_3(%arg0: i32) -> (i32, i32) {
    %c0_i32 = arith.constant 0 : i32
    %c0_i32_0 = arith.constant 0 : i32
    return %arg0, %c0_i32 : i32, i32
  }
  func.func @transform_4(%arg0: i32) -> (i32, i32) {
    %c0_i32 = arith.constant 0 : i32
    %c0_i32_0 = arith.constant 0 : i32
    return %arg0, %c0_i32 : i32, i32
  }
  func.func @transform_5(%arg0: i32) -> (i32, i32) {
    %c0_i32 = arith.constant 0 : i32
    %c0_i32_0 = arith.constant 0 : i32
    return %arg0, %c0_i32 : i32, i32
  }
}

</mosaic_0001>

<bundles_post_ra>
// kernel: tpu_custom_call.1
= control target key start
LH: loop header
LB: loop body
LE: loop exit
PB: predicated region body
PF: predicated region fallthrough
CT: control target
= control target key end

     0   :  { %11 = vsyncpa [#allocation3], 0  ;;  %s1100_s0 = inlined_call_operand.vmem [shape: f32[16,1], index: 0, kind: input, shape index: {}]   ;;  %s1101_s1 = inlined_call_operand.hbm [shape: f32[16,256], index: 1, kind: input, shape index: {}]   ;;  %s1102_s2 = inlined_call_operand.hbm [shape: f32[16,256], index: 2, kind: input, shape index: {}]   ;;  %s1103_s3 = inlined_call_operand.hbm [shape: f32[16,128], index: 3, kind: output, shape index: {0}]   ;;  %s1104_s4 = inlined_call_operand.hbm [shape: f32[16,128], index: 4, kind: output, shape index: {1}]   ;;  %s1105_s5 = inlined_call_operand.vmem [shape: f32[16,2], index: 5, kind: output, shape index: {2}]  }
   0x1   :  { %13 = vsyncpa [#allocation3 + $0x1], 0 }
   0x2   :  { %14 = vsyncpa [#allocation6], 0 }
   0x3   :  { %16 = vsyncpa [#allocation6 + $0x1], 0 }
   0x4   :  { %17 = vsyncpa [#allocation4], 0 }
   0x5   :  { %19 = vsyncpa [#allocation4 + $0x1], 0 }
   0x6   :  { %20 = vsyncpa [#allocation9], 0 }
   0x7   :  { %22 = vsyncpa [#allocation9 + $0x1], 0  ;;  %s866_s18 = smov 0   ;;  %s868_s19 = smov 0  }
   0x8   :  { %s870_s20 = smov 0   ;;  %s872_s21 = smov 0  }
   0x9 LB: > { %s887_s22 = sadd.s32 4294967295, %s829_s21   ;;  %s583_s23 = sadd.s32 4294967294, %s829_s21   ;;  %s829_s21 = sphi %s872_s21, %s1128_s21   ;;  %s825_s20 = sphi %s870_s20, %s1127_s20   ;;  %s821_s19 = sphi %s868_s19, %s1126_s19   ;;  %s817_s18 = sphi %s866_s18, %s1125_s18  }
   0xa   : > { %s891_s24 = sadd.s32 1, %s829_s21   ;;  %s61_s25 = sadd.s32 1, %s825_s20 }
   0xb   : > { %s58_s26 = ssub.s32 %s829_s21, %s891_s24  ;;  %p68_p0 = scmp.ne.s32.totalorder %s825_s20, %s821_s19 }
   0xc   : > { %p59_p1 = scmp.eq.s32.totalorder %s58_s26, 0  ;;  %p69_p2 = scmp.eq.s32.totalorder %s829_s21, 0 }
   0xd   : > { %p74_p3 = scmp.ne.s32.totalorder %s821_s19, %s817_s18  ;;  %p75_p4 = scmp.eq.s32.totalorder %s887_s22, 0 }
   0xe   : > { %s903_s27 = scalar_select %p59_p1, %s825_s20, %s61_s25  }
   0xf   : > { %p905_p5 = por %p69_p2, %p68_p0  ;;  %p909_p6 = por %p75_p4, %p74_p3 }
  0x10   : > { %p124_p7 = scmp.eq.s32.totalorder %s887_s22, 1  ;;  %p130_p8 = scmp.eq.s32.totalorder %s583_s23, 1 }
  0x11   : > { %s1111_s29 = scalar_select %p909_p6, 1, 0 }
  0x12   : > { %p631_p10 = scmp.lt.s32.totalorder %s829_s21, 2  ;;  %p916_p11 = por %p124_p7, %p68_p0 }
  0x13   : > { %p920_p12 = por %p130_p8, %p74_p3  ;;  %s925_s7 = sand.u32 1, %s825_s20  }
  0x14   : > { %s1112_s30 = scalar_select %p916_p11, 1, 0 }
  0x15   : > { %s1113_s6 = scalar_select %p920_p12, 1, 0 }
  0x16   : > { %s607_s8 = sshll.u32 %s829_s21, 8  ;;  %s586_s9 = sshll.u32 %s925_s7, 4 }
  0x17   : > { %s934_s12 = scalar_lea.hbm %s1101_s1, %s607_s8  ;;  %s213_s13 = scalar_lea.vmem [#allocation2], %s586_s9 }
  0x18   : > { %s221_s14 = sshll.u32 %s213_s13, 4  ;;  %p940_p13 = pnand %p631_p10, %p905_p5  ;;  %s944_s14 = int_to_ptr.vmem [resolvable:$true] %s221_s14 }
  0x19   : > { %s210_s16 = scalar_lea.sflag [#allocation3], %s925_s7  ;;  %s675_s17 = scalar_lea.hbm %s934_s12, 256 }
  0x1a   : > { %p676_p2 = scmp.ne.s32.totalorder %s934_s12, %s675_s17  ;;  %p677_p3 = pneg %p940_p13 }
  0x1b   : > { %s680_s26 = scalar_lea.hbm %s1101_s1, 512  ;;  %p681_p5 = scmp.lt.s32.totalorder %s934_s12, %s1101_s1 }
  0x1c   : > { %p678_p4 = pnand %p677_p3, %p676_p2  ;;  %p682_p8 = scmp.lt.s32.totalorder %s680_s26, %s675_s17 }
  0x1e   : > { %p679_p7 = pneg %p678_p4  ;;  %p683_p10 = por %p682_p8, %p681_p5 }
  0x20   : > { %p684_p9 = pnand %p683_p10, %p679_p7 }
  0x22   : > { %687 = shalt.err (!%p684_p9)
}
  0x23   : > { %s688_s11 = scalar_lea.vmem %s944_s14, 256  ;;  %s831_s13 = smov [#allocation2]  }
  0x24   : > { %p689_p0 = scmp.ne.s32.totalorder %s944_s14, %s688_s11  ;;  %s693_s23 = sshll.u32 %s831_s13, 4  ;;  %s694_s23 = int_to_ptr.vmem [resolvable:$false] %s693_s23 }
  0x25   : > { %s695_s25 = scalar_lea.vmem %s694_s23, 512  ;;  %p696_p1 = scmp.lt.s32.totalorder %s944_s14, %s694_s23 }
  0x26   : > { %p691_p2 = pnand %p689_p0, %p677_p3  ;;  %p697_p12 = scmp.lt.s32.totalorder %s695_s25, %s688_s11 }
  0x28   : > { %p692_p4 = pneg %p691_p2  ;;  %p698_p11 = por %p697_p12, %p696_p1 }
  0x2a   : > { %p699_p5 = pnand %p698_p11, %p692_p4 }
  0x2c   : > { %702 = shalt.err (!%p699_p5)
}
  0x2d   : > { %620 = dma.hbm_to_vmem [thread:$0]  (!%p940_p13), %s934_s12, 256, %s944_s14, %s210_s16  }
  0x2e   : > { %p1115_p9 = scmp.lt.s32.totalorder %s829_s21, 3  ;;  %p1116_p0 = scmp.ge.s32.totalorder %s829_s21, 1 }
  0x2f   : > { %s986_s10 = scalar_lea.hbm %s1102_s2, %s607_s8  ;;  %s232_s11 = scalar_lea.vmem [#allocation5], %s586_s9 }
  0x30   : > { %p977_p7 = pnand %p1116_p0, %p1115_p9  ;;  %s240_s13 = sshll.u32 %s232_s11, 4  ;;  %s241_s13 = int_to_ptr.vmem [resolvable:$true] %s240_s13 }
  0x31   : > { %s229_s12 = scalar_lea.sflag [#allocation6], %s925_s7  ;;  %s703_s14 = scalar_lea.hbm %s986_s10, 256 }
  0x32   : > { %s1117_s17 = scalar_select %p977_p7, 1, 0 }
  0x33   : > { %p704_p11 = scmp.ne.s32.totalorder %s986_s10, %s703_s14  ;;  %s708_s25 = scalar_lea.hbm %s1102_s2, 512 }
  0x34   : > { %p709_p8 = scmp.lt.s32.totalorder %s986_s10, %s1102_s2  ;;  %p710_p10 = scmp.lt.s32.totalorder %s708_s25, %s703_s14 }
  0x35   : > { %p706_p12 = pnand %p704_p11, %p677_p3 }
  0x36   : > { %p711_p2 = por %p710_p10, %p709_p8 }
  0x37   : > { %p707_p1 = pneg %p706_p12 }
  0x39   : > { %p712_p4 = pnand %p711_p2, %p707_p1 }
  0x3b   : > { %715 = shalt.err (!%p712_p4)
}
  0x3c   : > { %s716_s9 = scalar_lea.vmem %s241_s13, 256  ;;  %s832_s7 = smov [#allocation5]  }
  0x3d   : > { %p717_p5 = scmp.ne.s32.totalorder %s241_s13, %s716_s9  ;;  %s721_s28 = sshll.u32 %s832_s7, 4  ;;  %s722_s28 = int_to_ptr.vmem [resolvable:$false] %s721_s28 }
  0x3e   : > { %s723_s11 = scalar_lea.vmem %s722_s28, 512  ;;  %p724_p11 = scmp.lt.s32.totalorder %s241_s13, %s722_s28 }
  0x3f   : > { %p719_p9 = pnand %p717_p5, %p677_p3  ;;  %p725_p12 = scmp.lt.s32.totalorder %s723_s11, %s716_s9 }
  0x41   : > { %p720_p0 = pneg %p719_p9  ;;  %p726_p6 = por %p725_p12, %p724_p11 }
  0x43   : > { %p727_p7 = pnand %p726_p6, %p720_p0 }
  0x45   : > { %730 = shalt.err (!%p727_p7)
}
  0x46   : > { %623 = dma.hbm_to_vmem [thread:$0]  (!%p940_p13), %s986_s10, 256, %s241_s13, %s229_s12  }
  0x47   : > { %p1118_p1 = scmp.ne.s32.totalorder %s1117_s17, 0 }
  0x48   : > { %s1012_s14 = sand.u32 (!%p1118_p1), 1, %s821_s19   ;;  %p1119_p3 = scmp.ne.s32.totalorder (!%p1118_p1), %s1111_s29, 0 }
  0x49   : > { %249 = sbr.rel (%p1118_p1) target bundleno = 398 (0x18e), region = 32  ;;  %s593_s16 = sshll.u32 (!%p1118_p1), %s1012_s14, 4 }
  0x4a   : > { %s252_s23 = scalar_lea.sflag (!%p1118_p1), [#allocation3], %s1012_s14  ;;  %s255_s25 = scalar_lea.vmem (!%p1118_p1), [#allocation2], %s593_s16 }
  0x4e   : > { %800 = dma.done.wait (%p1119_p3), %s252_s23, 256  }
  0x4f   : > { %802 = vsyncadd (%p1119_p3), %s252_s23, 4294967040  ;;  %s261_s15 = scalar_lea.sflag [#allocation6], %s1012_s14  ;;  %s264_s10 = scalar_lea.vmem [#allocation5], %s593_s16 }
  0x50   : > { %804 = dma.done.wait (%p1119_p3), %s261_s15, 256  }
  0x51   : > { %806 = vsyncadd (%p1119_p3), %s261_s15, 4294967040  ;;  %p309_p6 = scmp.lt.s32.totalorder %s887_s22, 1  ;;  %v833_v0 = vmov 0   ;;  %v321_v3 = vld [vmem:[%s264_s10] sm:$0xff]  ;;  %v322_v4 = vld [vmem:[%s264_s10 + $0x8] sm:$0xff]  ;;  %s595_s29 = sshll.u32 %s1012_s14, 3 }
  0x52   : > { %666 = vset.pattern.permute.xlu0 %v833_v0  ;;  %361 = vadd.xlane.f32.xlu1 %v321_v3  ;;  %v343_v5 = vmul.f32 1.442695, %v322_v4  ;;  %v341_v6 = vmul.f32 1.442695, %v321_v3  ;;  %v319_v7 = vld [vmem:[%s255_s25] sm:$0xff]  ;;  %v320_v8 = vld [vmem:[%s255_s25 + $0x8] sm:$0xff] }
  0x53   : > { %s1027_s17 = scalar_select %p309_p6, %s887_s22, 1  ;;  %v323_v9 = vsub.f32 %v319_v7, %v320_v8 }
  0x54   : > { %667 = vpow2.f32 %v343_v5  ;;  %s295_s9 = scalar_lea.vmem [#allocation7], %s595_s29  ;;  %s1036_s7 = scalar_lea.vmem [#allocation8], %s595_s29 }
  0x55   : > { %s1108_s13 = sshll.u32 %s1027_s17, 3  ;;  %669 = vpow2.f32 %v341_v6  ;;  %s1109_s28 = sshll.u32 %s887_s22, 7 }
  0x56   : > { %s312_s26 = scalar_lea.vmem %s1100_s0, %s1108_s13  ;;  %s406_s11 = sshll.u32 %s295_s9, 4  ;;  %s407_s11 = int_to_ptr.vmem [resolvable:$true] %s406_s11 }
  0x57   : > { %v317_v1 = vld [vmem:[%s312_s26] sm:$0xff]  ;;  %s404_s25 = scalar_lea.hbm %s1103_s3, %s1109_s28  ;;  %s384_s15 = scalar_lea.sflag [#allocation4], %s1012_s14 }
  0x58   : > { %326 = vperm.xlu0 %666, %v317_v1   ;;  %v318_v2 = vsub.f32 1.0, %v317_v1  ;;  %s731_s10 = scalar_lea.vmem %s407_s11, 128  ;;  %p1120_p7 = scmp.ne.s32.totalorder %s1112_s30, 0 }
  0x59   : > { %p732_p13 = scmp.ne.s32.totalorder %s407_s11, %s731_s10  ;;  %s834_s12 = smov [#allocation7]  }
  0x5a   : > { %s735_s8 = sshll.u32 %s834_s12, 4  ;;  %s736_s8 = int_to_ptr.vmem [resolvable:$false] %s735_s8 }
  0x5b   : > { %p733_p8 = pnand %p732_p13, %p1120_p7  ;;  %s737_s26 = scalar_lea.vmem %s736_s8, 256 }
  0x5c   : > { %332 = vperm.xlu0 %666, %v318_v2   ;;  %p738_p2 = scmp.lt.s32.totalorder %s407_s11, %s736_s8  ;;  %p739_p4 = scmp.lt.s32.totalorder %s737_s26, %s731_s10 }
  0x5d   : > { %p734_p10 = pneg %p733_p8 }
  0x5e   : > { %p740_p5 = por %p739_p4, %p738_p2 }
  0x60   : > { %p741_p9 = pnand %p740_p5, %p734_p10 }
  0x61   : > { %v668_v13 = vpop.eup %667 }
  0x62   : > { %v670_v18 = vpop.eup %669 }
  0x7b   : > { %363 = vadd.xlane.f32.xlu0 %v322_v4 }
  0xd3   : > { %v327_v10 = vpop.permute.xlu0 %326 }
  0xd4   : > { %v339_v11 = vmul.f32 %v327_v10, %v323_v9  ;;  %v329_v15 = vmul.f32 %v327_v10, %v319_v7 }
  0xd6   : > { %v340_v12 = vmul.f32 %v339_v11, %v339_v11 }
  0xd7   : > { %v333_v14 = vpop.permute.xlu0 %332 }
  0xd8   : > { %v335_v16 = vmul.f32 %v333_v14, %v320_v8  ;;  %v337_v17 = vmul.f32 %v333_v14, %v323_v9  ;;  %v346_v21 = vadd.f32 %v668_v13, %v340_v12 }
  0xda   : > { %v336_v19 = vadd.f32 %v335_v16, %v329_v15  ;;  %v338_v20 = vmul.f32 %v337_v17, %v337_v17  ;;  %v348_v24 = vmul.f32 %v346_v21, %v333_v14 }
  0xdc   : > { %v345_v22 = vadd.f32 %v670_v18, %v338_v20  ;;  %353 = vst [vmem:[%s295_s9] sm:$0xff] %v336_v19 }
  0xde   : > { %v347_v23 = vmul.f32 %v345_v22, %v327_v10 }
  0xe0   : > { %v349_v25 = vadd.f32 %v348_v24, %v347_v23 }
  0xe2   : > { %v350_v26 = vadd.f32 1e-08, %v349_v25 }
  0xe4   : > { %671 = vlog2.f32 %v350_v26 }
  0xe5   : > { %673 = vrcp.f32 %v350_v26 }
  0xf1   : > { %v672_v27 = vpop.eup %671 }
  0xf2   : > { %v674_v28 = vpop.eup %673  ;;  %v352_v29 = vmul.f32 0.6931472, %v672_v27 }
  0xf3   : > { %v356_v30 = vmul.f32 %v674_v28, %v350_v26 }
  0xf4   : > { %359 = vadd.xlane.f32.xlu1 %v352_v29  ;;  %354 = vst [vmem:[%s1036_s7] sm:$0xff] %v352_v29 }
  0xf5   : > { %v357_v31 = vsub.f32 2.0, %v356_v30 }
  0xf7   : > { %v358_v32 = vmul.f32 %v674_v28, %v357_v31 }
  0xf9   : > { %v365_v33 = vmul.f32 %v358_v32, %v345_v22  ;;  %v368_v34 = vmul.f32 %v358_v32, %v346_v21 }
  0xfb   : > { %366 = vadd.xlane.f32.xlu1 %v365_v33 }
  0xff   : > { %369 = vadd.xlane.f32.xlu1 %v368_v34 }
 0x100   : > { %744 = shalt.err (!%p741_p9)
}
 0x101   : > { %s745_s29 = scalar_lea.hbm %s404_s25, 128  ;;  %s749_s23 = scalar_lea.hbm %s1103_s3, 256 }
 0x102   : > { %p746_p0 = scmp.ne.s32.totalorder %s404_s25, %s745_s29  ;;  %p750_p1 = scmp.lt.s32.totalorder %s404_s25, %s1103_s3 }
 0x103   : > { %p751_p3 = scmp.lt.s32.totalorder %s749_s23, %s745_s29 }
 0x104   : > { %p747_p11 = pnand %p746_p0, %p1120_p7 }
 0x105   : > { %p752_p6 = por %p751_p3, %p750_p1 }
 0x106   : > { %p748_p12 = pneg %p747_p11 }
 0x108   : > { %p753_p13 = pnand %p752_p6, %p748_p12 }
 0x10a   : > { %756 = shalt.err (!%p753_p13)
}
 0x10b   : > { %613 = dma.vmem_to_hbm [thread:$0]  (%p1120_p7), %s407_s11, 128, %s404_s25, %s384_s15  }
 0x10c   : > { %s1121_s10 = sshll.u32 %s887_s22, 7  ;;  %s419_s9 = sshll.u32 %s1036_s7, 4  ;;  %s420_s9 = int_to_ptr.vmem [resolvable:$true] %s419_s9 }
 0x10d   : > { %s417_s26 = scalar_lea.hbm %s1104_s4, %s1121_s10  ;;  %s389_s13 = scalar_lea.sflag [#allocation9], %s1012_s14 }
 0x10e   : > { %s757_s28 = scalar_lea.vmem %s420_s9, 128  ;;  %s835_s29 = smov [#allocation8]  }
 0x10f   : > { %p758_p8 = scmp.ne.s32.totalorder %s420_s9, %s757_s28  ;;  %s761_s16 = sshll.u32 %s835_s29, 4  ;;  %s762_s16 = int_to_ptr.vmem [resolvable:$false] %s761_s16 }
 0x110   : > { %s763_s23 = scalar_lea.vmem %s762_s16, 256  ;;  %p764_p4 = scmp.lt.s32.totalorder %s420_s9, %s762_s16 }
 0x111   : > { %p759_p10 = pnand %p758_p8, %p1120_p7  ;;  %p765_p5 = scmp.lt.s32.totalorder %s763_s23, %s757_s28 }
 0x113   : > { %p760_p2 = pneg %p759_p10  ;;  %p766_p9 = por %p765_p5, %p764_p4 }
 0x115   : > { %p767_p0 = pnand %p766_p9, %p760_p2 }
 0x117   : > { %770 = shalt.err (!%p767_p0)
}
 0x118   : > { %s771_s22 = scalar_lea.hbm %s417_s26, 128  ;;  %s775_s11 = scalar_lea.hbm %s1104_s4, 256 }
 0x119   : > { %p772_p11 = scmp.ne.s32.totalorder %s417_s26, %s771_s22  ;;  %p776_p3 = scmp.lt.s32.totalorder %s417_s26, %s1104_s4 }
 0x11a   : > { %p777_p6 = scmp.lt.s32.totalorder %s775_s11, %s771_s22 }
 0x11b   : > { %p773_p12 = pnand %p772_p11, %p1120_p7 }
 0x11c   : > { %p778_p13 = por %p777_p6, %p776_p3 }
 0x11d   : > { %p774_p1 = pneg %p773_p12 }
 0x11f   : > { %p779_p8 = pnand %p778_p13, %p774_p1 }
 0x121   : > { %782 = shalt.err (!%p779_p8)
}
 0x122   : > { %614 = dma.vmem_to_hbm [thread:$0]  (%p1120_p7), %s420_s9, 128, %s417_s26, %s389_s13   ;;  %v362_v35 = vpop.xlane.xlu1 %361  ;;  %v364_v38 = vpop.xlane.xlu0 %363  ;;  %vm375_vm0 = vcmask 7168   ;;  %vm381_vm1 = vcmask 15368  }
 0x123   : > { %s1122_s10 = sshll.u32 %s1027_s17, 3 }
 0x124   : > { %s316_s28 = scalar_lea.vmem %s1105_s5, %s1122_s10 }
 0x17d   : > { %v360_v36 = vpop.xlane.xlu1 %359 }
 0x17e   : > { %v371_v37 = vsub.f32 %v360_v36, %v362_v35  ;;  %v377_v40 = vsub.f32 %v360_v36, %v364_v38 }
 0x180   : > { %v599_v39 = vadd.f32 -128.0, %v371_v37  ;;  %v600_v43 = vadd.f32 -128.0, %v377_v40 }
 0x184   : > { %v367_v41 = vpop.xlane.xlu1 %366 }
 0x185   : > { %v373_v42 = vadd.f32 %v599_v39, %v367_v41 }
 0x187   : > { %v374_v44 = vmul.f32 0.5, %v373_v42 }
 0x188   : > { %v370_v45 = vpop.xlane.xlu1 %369 }
 0x189   : > { %376 = vst.msk [vmem:[%s316_s28] sm:$0xff] %vm375_vm0, %v374_v44  ;;  %v379_v46 = vadd.f32 %v600_v43, %v370_v45 }
 0x18b   : > { %v380_v47 = vmul.f32 0.5, %v379_v46 }
 0x18d   : > { %382 = vst.msk [vmem:[%s316_s28] sm:$0xff] %vm381_vm1, %v380_v47 }
 0x18e PF: > { %s434_s30 = sand.u32 1, %s817_s18   ;;  %p1123_p7 = scmp.ne.s32.totalorder %s1113_s6, 0 }
 0x18f   : > { %p1124_p10 = scmp.ge.s32.totalorder %s829_s21, 2  ;;  %s435_s17 = scalar_lea.sflag [#allocation4], %s434_s30 }
 0x191   : > { %p625_p2 = pnand %p1124_p10, %p1123_p7 }
 0x193   : > { %p626_p4 = pneg %p625_p2 }
 0x195   : > { %808 = dma.done.wait (%p626_p4), %s435_s17, 128  }
 0x196   : > { %810 = vsyncadd (%p626_p4), %s435_s17, 4294967168  ;;  %s444_s26 = scalar_lea.sflag [#allocation9], %s434_s30 }
 0x197   : > { %812 = dma.done.wait (%p626_p4), %s444_s26, 128  }
 0x198   : > { %814 = vsyncadd (%p626_p4), %s444_s26, 4294967168  ;;  %p25_p5 = scmp.ge.s32.totalorder %s891_s24, 4   ;;  %s1125_s18 = smov %s821_s19 }
 0x199   : > { %s1126_s19 = smov %s825_s20  ;;  %s1127_s20 = smov %s903_s27 }
 0x19a   : > { %s1128_s21 = smov %s891_s24  ;;  %27 = sbr.rel (!%p25_p5) target bundleno = 9 (0x9), region = 122 }
 0x19f   :  { %456 = vsyncpa [#allocation3], 1 }
 0x1a0   :  { %458 = vsyncpa [#allocation3 + $0x1], 1 }
 0x1a1   :  { %459 = vsyncpa [#allocation6], 1 }
 0x1a2   :  { %461 = vsyncpa [#allocation6 + $0x1], 1 }
 0x1a3   :  { %462 = vsyncpa [#allocation4], 1 }
 0x1a4   :  { %464 = vsyncpa [#allocation4 + $0x1], 1 }
 0x1a5   :  { %465 = vsyncpa [#allocation9], 1 }
 0x1a6   :  { %467 = vsyncpa [#allocation9 + $0x1], 1 }

</bundles_post_ra>
